<compile_context>
chip_gen: v7x
topology: tpu7x:2x2x1
jax: 0.10.0
libtpu: 0.0.40
codegen_flags: <defaults>
</compile_context>

<pallas_src>
import jax
import jax.numpy as jnp
from jax.experimental import pallas as pl
from jax.experimental.pallas import tpu as pltpu


_VMEM_LIMIT = 64 * 1024 * 1024  # explicit scoped-VMEM limit (safe on v5e..v7x)


def _round_up(x, m):
    return ((x + m - 1) // m) * m


def _pick_tile(dim, candidates):
    """Largest candidate that divides dim, else the full dim."""
    for c in candidates:
        if dim % c == 0:
            return c
    return dim


def _row_tile(m):
    """MXU-matched row tile (256 on v6e/v7x-sized problems) + padded extent."""
    if m % 256 == 0 or m > 256:
        tm = 256
    elif m % 128 == 0 or m > 128:
        tm = 128
    else:
        tm = _round_up(m, 8)
    return tm, _round_up(m, tm)


# ---------------------------------------------------------------------------
# Kernel 1: (M, N, K)-tiled linear projection  (out = x @ W + b)
# ---------------------------------------------------------------------------
def _linear_kernel(x_ref, w_ref, b_ref, o_ref, acc_ref):
    @pl.when(pl.program_id(2) == 0)
    def _():
        acc_ref[...] = jnp.zeros(acc_ref.shape, jnp.float32)

    acc_ref[...] += jnp.dot(x_ref[...], w_ref[...],
                            preferred_element_type=jnp.float32)

    @pl.when(pl.program_id(2) == pl.num_programs(2) - 1)
    def _():
        o_ref[...] = (acc_ref[...] + b_ref[...]).astype(o_ref.dtype)


def _linear(x2, w, b, *, out_dtype):
    M, K = x2.shape
    _, N = w.shape

    tm, m_pad = _row_tile(M)
    if m_pad != M:
        x2 = jnp.pad(x2, ((0, m_pad - M), (0, 0)))
    tn = _pick_tile(N, (512, 256, 128))
    tk = _pick_tile(K, (512, 256))

    out = pl.pallas_call(
        _linear_kernel,
        out_shape=jax.ShapeDtypeStruct((m_pad, N), out_dtype),
        grid_spec=pltpu.PrefetchScalarGridSpec(
            num_scalar_prefetch=0,
            grid=(m_pad // tm, N // tn, K // tk),
            in_specs=[
                pl.BlockSpec((tm, tk), lambda i, j, k: (i, k)),   # x row tile
                pl.BlockSpec((tk, tn), lambda i, j, k: (k, j)),   # weight tile
                pl.BlockSpec((1, tn), lambda i, j, k: (0, j)),    # bias tile
            ],
            out_specs=pl.BlockSpec((tm, tn), lambda i, j, k: (i, j)),
            scratch_shapes=[pltpu.VMEM((tm, tn), jnp.float32)],
        ),
        compiler_params=pltpu.CompilerParams(
            dimension_semantics=("parallel", "parallel", "arbitrary"),
            vmem_limit_bytes=_VMEM_LIMIT),
    )(x2, w, b)
    return out[:M] if m_pad != M else out


# ---------------------------------------------------------------------------
# Kernel 2: flash-style causal attention over (batch, head-group, q-tile, kv-tile)
# ---------------------------------------------------------------------------
def _flash_attn_kernel(q_ref, k_ref, v_ref, o_ref, m_sc, l_sc, acc_sc):
    # q_ref/o_ref: [hg, tq, hd]; k_ref/v_ref: [hg, tk, hd] (bf16, scale folded
    # into q via the QKV weights).  Scratch m/l: [hg, tq, 1] f32, acc f32.
    qi = pl.program_id(2)
    ki = pl.program_id(3)

    @pl.when(ki == 0)
    def _init():
        m_sc[...] = jnp.full(m_sc.shape, -jnp.inf, jnp.float32)
        l_sc[...] = jnp.zeros(l_sc.shape, jnp.float32)
        acc_sc[...] = jnp.zeros(acc_sc.shape, jnp.float32)

    def _tile(masked):
        s = jnp.einsum("hqd,hkd->hqk", q_ref[...], k_ref[...],
                       preferred_element_type=jnp.float32)
        if masked:
            # Tile-local mask: only the diagonal tile needs it (tq == tk, so
            # the global q/k offsets cancel).  Diagonal stays unmasked -> no
            # fully-masked rows / NaNs.
            row = jax.lax.broadcasted_iota(jnp.int32, s.shape, 1)
            col = jax.lax.broadcasted_iota(jnp.int32, s.shape, 2)
            s = jnp.where(col <= row, s, -jnp.inf)

        m_prev = m_sc[...]
        m_new = jnp.maximum(m_prev, jnp.max(s, axis=-1, keepdims=True))
        alpha = jnp.exp(m_prev - m_new)
        # bf16 exp (EUP bf16 on v6e/v7x); accumulation stays f32.
        p = jnp.exp((s - m_new).astype(jnp.bfloat16))
        l_sc[...] = alpha * l_sc[...] + jnp.sum(
            p.astype(jnp.float32), axis=-1, keepdims=True)
        acc_sc[...] = alpha * acc_sc[...] + jnp.einsum(
            "hqk,hkd->hqd", p, v_ref[...], preferred_element_type=jnp.float32)
        m_sc[...] = m_new

    @pl.when(ki < qi)          # strictly below the diagonal: no mask needed
    def _body():
        _tile(masked=False)

    @pl.when(ki == qi)         # diagonal tile: mask + finalize
    def _diag():
        _tile(masked=True)
        o_ref[...] = (acc_sc[...] *
                      pl.reciprocal(l_sc[...], approx=True)).astype(o_ref.dtype)
    # ki > qi: fully-masked causal tile -> no compute, and the k/v index_maps
    # clamp to the diagonal block so no new DMA is issued either.


def _flash_attention(q, k, v):
    # q, k, v: [B, H, T, hd] bf16 (q pre-scaled by 1/sqrt(hd)).
    B, H, T, hd = q.shape

    # Head grouping: smallest divisor of H with hg*hd >= 128 (lane-dense-ish
    # work per step); fall back to all heads for tiny models.
    hg = H
    for cand in range(1, H + 1):
        if H % cand == 0 and cand * hd >= 128:
            hg = cand
            break

    # q/kv tile size (tq == tk so only diagonal tiles need masking).  Falls
    # back to full T when T is not tile-divisible (small/odd sequences).
    tile = T
    for cand in (256, 128):
        if T % cand == 0:
            tile = cand
            break

    qo_spec = pl.BlockSpec((None, hg, tile, hd),
                           lambda b, h, qi, ki: (b, h, qi, 0))
    kv_spec = pl.BlockSpec((None, hg, tile, hd),
                           lambda b, h, qi, ki: (b, h, jnp.minimum(ki, qi), 0))

    return pl.pallas_call(
        _flash_attn_kernel,
        out_shape=jax.ShapeDtypeStruct((B, H, T, hd), jnp.bfloat16),
        grid_spec=pltpu.PrefetchScalarGridSpec(
            num_scalar_prefetch=0,
            grid=(B, H // hg, T // tile, T // tile),
            in_specs=[qo_spec, kv_spec, kv_spec],
            out_specs=qo_spec,
            scratch_shapes=[
                pltpu.VMEM((hg, tile, 1), jnp.float32),    # running max
                pltpu.VMEM((hg, tile, 1), jnp.float32),    # running denom
                pltpu.VMEM((hg, tile, hd), jnp.float32),   # output accumulator
            ],
        ),
        compiler_params=pltpu.CompilerParams(
            dimension_semantics=("parallel", "parallel", "parallel",
                                 "arbitrary"),
            vmem_limit_bytes=_VMEM_LIMIT),
    )(q, k, v)


# ---------------------------------------------------------------------------
# Wrapper: full CausalSelfAttention forward (eval mode, dropout = 0)
# ---------------------------------------------------------------------------
def causal_self_attention(x, w_qkv, b_qkv, w_proj, b_proj, *, n_head):
    B, T, C = x.shape
    assert C % n_head == 0
    hd = C // n_head
    M = B * T
    out_dtype = x.dtype

    # Fold 1/sqrt(hd) into the q columns of the QKV weights (zero runtime cost).
    scale = 1.0 / (hd ** 0.5)
    w_qkv_s = jnp.concatenate([w_qkv[:, :C] * scale, w_qkv[:, C:]], axis=1)
    b_qkv_s = jnp.concatenate([b_qkv[:, :C] * scale, b_qkv[:, C:]], axis=1)

    # bf16 operands for all MXU matmuls; biases / accumulators stay f32.
    x2 = x.reshape(M, C).astype(jnp.bfloat16)
    wqkv_bf = w_qkv_s.astype(jnp.bfloat16)
    wproj_bf = w_proj.astype(jnp.bfloat16)
    bqkv = b_qkv_s.astype(jnp.float32)
    bproj = b_proj.astype(jnp.float32)

    # --- QKV projection: [M, C] @ [C, 3C] + b -> [M, 3C] (bf16, tiled) ---
    qkv = _linear(x2, wqkv_bf, bqkv, out_dtype=jnp.bfloat16)

    # --- split into per-head q/k/v: [B, H, T, hd] ---
    # TODO(synk): fuse these XLA-side transposes into the projection /
    # attention BlockSpecs (write [B, H, T, hd] directly) to remove the extra
    # HBM round trips.
    qkv = qkv.reshape(B, T, 3, n_head, hd).transpose(2, 0, 3, 1, 4)
    q, k, v = qkv[0], qkv[1], qkv[2]

    # --- flash-style causal attention ---
    y = _flash_attention(q, k, v)                    # [B, H, T, hd] bf16
    y2 = y.transpose(0, 2, 1, 3).reshape(M, C)       # [M, C] bf16

    # --- output projection: [M, C] @ [C, C] + b -> [M, C] ---
    out = _linear(y2, wproj_bf, bproj, out_dtype=out_dtype)

    # TODO(synk): attn_dropout / resid_dropout omitted — eval mode (p = 0).
    return out.reshape(B, T, C)


# ---------------------------------------------------------------------------
# Pure-JAX f32 reference mirroring the PyTorch forward (eval mode)
# ---------------------------------------------------------------------------
def reference(x, w_qkv, b_qkv, w_proj, b_proj, n_head):
    B, T, C = x.shape
    hd = C // n_head
    qkv = x @ w_qkv + b_qkv            # [B, T, 3C]
    q, k, v = jnp.split(qkv, 3, axis=-1)

    def heads(t):
        return t.reshape(B, T, n_head, hd).transpose(0, 2, 1, 3)

    q, k, v = heads(q), heads(k), heads(v)
    att = jnp.einsum("bhtd,bhsd->bhts", q, k) / jnp.sqrt(hd).astype(x.dtype)
    mask = jnp.tril(jnp.ones((T, T), bool))
    att = jnp.where(mask, att, -jnp.inf)
    att = jax.nn.softmax(att, axis=-1)
    y = jnp.einsum("bhts,bhsd->bhtd", att, v)
    y = y.transpose(0, 2, 1, 3).reshape(B, T, C)
    return y @ w_proj + b_proj


if __name__ == "__main__":
    # Config: n_embd=32, n_head=4, block_size>=T, bias=True, dropout=0.0
    B, T, C, n_head = 2, 8, 32, 4

    key = jax.random.PRNGKey(0)
    k1, k2, k3, k4, k5 = jax.random.split(key, 5)
    x = jax.random.normal(k1, (B, T, C), dtype=jnp.float32)
    w_qkv = jax.random.normal(k2, (C, 3 * C), dtype=jnp.float32) * 0.02
    b_qkv = jax.random.normal(k3, (1, 3 * C), dtype=jnp.float32) * 0.02
    w_proj = jax.random.normal(k4, (C, C), dtype=jnp.float32) * 0.02
    b_proj = jax.random.normal(k5, (1, C), dtype=jnp.float32) * 0.02

    out = causal_self_attention(x, w_qkv, b_qkv, w_proj, b_proj, n_head=n_head)
    out = jax.block_until_ready(out)

    ref = reference(x, w_qkv, b_qkv, w_proj, b_proj, n_head)
    assert out.shape == (B, T, C)
    # bf16 MXU operands / bf16 exp -> looser tolerance than the f32 reference.
    assert jnp.allclose(out, ref, atol=2e-2, rtol=2e-2), "mismatch vs reference"

    print("KERNEL_OK")
</pallas_src>

<mosaic_0001>
module attributes {stable_mosaic.version = 11 : i64} {
  func.func @_linear_kernel(%arg0: i32, %arg1: i32, %arg2: i32, %arg3: memref<16x32xbf16, #tpu.memory_space<vmem>>, %arg4: memref<32x96xbf16, #tpu.memory_space<vmem>>, %arg5: memref<1x96xf32, #tpu.memory_space<vmem>>, %arg6: memref<16x96xbf16, #tpu.memory_space<vmem>>, %arg7: memref<16x96xf32, #tpu.memory_space<vmem>>) attributes {dimension_semantics = [#tpu.dimension_semantics<parallel>, #tpu.dimension_semantics<parallel>, #tpu.dimension_semantics<arbitrary>], iteration_bounds = array<i64: 1, 1, 1>, scalar_prefetch = 0 : i64, scratch_operands = 1 : i64, tpu.core_type = #tpu.core_type<tc>, window_params = [{transform_indices = @transform_0, window_bounds = array<i64: 16, 32>}, {transform_indices = @transform_1, window_bounds = array<i64: 32, 96>}, {transform_indices = @transform_2, window_bounds = array<i64: 1, 96>}, {transform_indices = @transform_3, window_bounds = array<i64: 16, 96>}]} {
    %c0_i32 = arith.constant 0 : i32
    %0 = arith.cmpi eq, %arg2, %c0_i32 : i32
    %1 = arith.extui %0 : i1 to i32
    %c0_i32_0 = arith.constant 0 : i32
    %2 = arith.cmpi ne, %1, %c0_i32_0 : i32
    scf.if %2 {
      %cst_10 = arith.constant 0.000000e+00 : f32
      %12 = vector.broadcast %cst_10 : f32 to vector<16x96xf32>
      %c0_11 = arith.constant 0 : index
      %c0_12 = arith.constant 0 : index
      %13 = vector.load %arg7[%c0_11, %c0_12] : memref<16x96xf32, #tpu.memory_space<vmem>>, vector<16x96xf32>
      tpu.vector_store %arg7[%c0_11, %c0_12], %12 {strides = array<i32>} : memref<16x96xf32, #tpu.memory_space<vmem>>, vector<16x96xf32>,
    } else {
    }
    %c0 = arith.constant 0 : index
    %c0_1 = arith.constant 0 : index
    %3 = vector.load %arg7[%c0, %c0_1] : memref<16x96xf32, #tpu.memory_space<vmem>>, vector<16x96xf32>
    %c0_2 = arith.constant 0 : index
    %c0_3 = arith.constant 0 : index
    %4 = vector.load %arg3[%c0_2, %c0_3] : memref<16x32xbf16, #tpu.memory_space<vmem>>, vector<16x32xbf16>
    %c0_4 = arith.constant 0 : index
    %c0_5 = arith.constant 0 : index
    %5 = vector.load %arg4[%c0_4, %c0_5] : memref<32x96xbf16, #tpu.memory_space<vmem>>, vector<32x96xbf16>
    %cst = arith.constant dense<0.000000e+00> : vector<16x96xf32>
    %6 = tpu.matmul %4, %5, %cst {dimension_numbers = #tpu.dot_dimension_numbers<[1], [0], [0], [1], [0, 0, 1, 1], [], []>} : vector<16x32xbf16>, vector<32x96xbf16>, vector<16x96xf32> -> vector<16x96xf32>
    %7 = arith.addf %3, %6 : vector<16x96xf32>
    %c0_6 = arith.constant 0 : index
    %c0_7 = arith.constant 0 : index
    %8 = vector.load %arg7[%c0_6, %c0_7] : memref<16x96xf32, #tpu.memory_space<vmem>>, vector<16x96xf32>
    tpu.vector_store %arg7[%c0_6, %c0_7], %7 {strides = array<i32>} : memref<16x96xf32, #tpu.memory_space<vmem>>, vector<16x96xf32>,
    %c0_i32_8 = arith.constant 0 : i32
    %9 = arith.cmpi eq, %arg2, %c0_i32_8 : i32
    %10 = arith.extui %9 : i1 to i32
    %c0_i32_9 = arith.constant 0 : i32
    %11 = arith.cmpi ne, %10, %c0_i32_9 : i32
    scf.if %11 {
      %c0_10 = arith.constant 0 : index
      %c0_11 = arith.constant 0 : index
      %12 = vector.load %arg7[%c0_10, %c0_11] : memref<16x96xf32, #tpu.memory_space<vmem>>, vector<16x96xf32>
      %c0_12 = arith.constant 0 : index
      %c0_13 = arith.constant 0 : index
      %13 = vector.load %arg5[%c0_12, %c0_13] : memref<1x96xf32, #tpu.memory_space<vmem>>, vector<1x96xf32>
      %14 = vector.broadcast %13 : vector<1x96xf32> to vector<16x96xf32>
      %15 = arith.addf %12, %14 : vector<16x96xf32>
      %16 = arith.truncf %15 : vector<16x96xf32> to vector<16x96xbf16>
      %c0_14 = arith.constant 0 : index
      %c0_15 = arith.constant 0 : index
      %17 = vector.load %arg6[%c0_14, %c0_15] : memref<16x96xbf16, #tpu.memory_space<vmem>>, vector<16x96xbf16>
      tpu.vector_store %arg6[%c0_14, %c0_15], %16 {strides = array<i32>} : memref<16x96xbf16, #tpu.memory_space<vmem>>, vector<16x96xbf16>,
    } else {
    }
    return
  }
  func.func @transform_0(%arg0: i32, %arg1: i32, %arg2: i32) -> (i32, i32) {
    %c0_i32 = arith.constant 0 : i32
    return %arg0, %arg2 : i32, i32
  }
  func.func @transform_1(%arg0: i32, %arg1: i32, %arg2: i32) -> (i32, i32) {
    %c0_i32 = arith.constant 0 : i32
    return %arg2, %arg1 : i32, i32
  }
  func.func @transform_2(%arg0: i32, %arg1: i32, %arg2: i32) -> (i32, i32) {
    %c0_i32 = arith.constant 0 : i32
    %c0_i32_0 = arith.constant 0 : i32
    return %c0_i32, %arg1 : i32, i32
  }
  func.func @transform_3(%arg0: i32, %arg1: i32, %arg2: i32) -> (i32, i32) {
    %c0_i32 = arith.constant 0 : i32
    return %arg0, %arg1 : i32, i32
  }
}

</mosaic_0001>

<bundles_post_ra>
// kernel: tpu_custom_call.1
= control target key start
LH: loop header
LB: loop body
LE: loop exit
PB: predicated region body
PF: predicated region fallthrough
CT: control target
= control target key end

     0   :  { %8 = vsyncpa [#allocation4], 0  ;;  %s401_s0 = inlined_call_operand.hbm [shape: bf16[16,32], index: 0, kind: input, shape index: {}]   ;;  %s402_s1 = inlined_call_operand.hbm [shape: bf16[32,96], index: 1, kind: input, shape index: {}]   ;;  %s403_s2 = inlined_call_operand.hbm [shape: f32[1,96], index: 2, kind: input, shape index: {}]   ;;  %s404_s3 = inlined_call_operand.hbm [shape: bf16[16,96], index: 3, kind: output, shape index: {}]  }
   0x1   :  { %9 = vsyncpa [#allocation7], 0 }
   0x2   :  { %10 = vsyncpa [#allocation5], 0  ;;  %s305_s12 = smov [#allocation6]   ;;  %s306_s14 = smov [#allocation3]  }
   0x3   :  { %s28_s13 = sshll.u32 %s305_s12, 4  ;;  %s16_s15 = sshll.u32 %s306_s14, 4  ;;  %s29_s13 = int_to_ptr.vmem [resolvable:$true] %s28_s13  ;;  %s333_s15 = int_to_ptr.vmem [resolvable:$true] %s16_s15 }
   0x4   :  { %s211_s18 = scalar_lea.hbm %s402_s1, 256 }
   0x5   :  { %p212_p0 = scmp.ne.s32.totalorder %s402_s1, %s211_s18  ;;  %p215_p1 = scmp.lt.u32.totalorder %s211_s18, %s402_s1 }
   0x7   :  { %p217_p2 = pnand %p215_p1, %p212_p0 }
   0x9   :  { %220 = shalt.err (!%p217_p2)
}
   0xa   :  { %s221_s23 = scalar_lea.vmem %s29_s13, 256  ;;  %p226_p4 = scmp.lt.s32.totalorder %s29_s13, %s29_s13 }
   0xb   :  { %p222_p3 = scmp.ne.s32.totalorder %s29_s13, %s221_s23  ;;  %p227_p5 = scmp.lt.s32.totalorder %s221_s23, %s221_s23 }
   0xd   :  { %p228_p6 = por %p227_p5, %p226_p4 }
   0xf   :  { %p229_p7 = pnand %p228_p6, %p222_p3 }
  0x11   :  { %232 = shalt.err (!%p229_p7)
}
  0x12   :  { %s307_s24 = smov 64   ;;  %s308_s25 = smov 4  }
  0x13   :  { %34 = dma.hbm_to_vmem [thread:$0]  %s402_s1, 256, %s29_s13, [#allocation7], %s307_s24, %s307_s24, %s308_s25  }
  0x14   :  { %s233_s30 = scalar_lea.hbm %s401_s0, 128 }
  0x15   :  { %p234_p8 = scmp.ne.s32.totalorder %s401_s0, %s233_s30  ;;  %p237_p9 = scmp.lt.u32.totalorder %s233_s30, %s401_s0 }
  0x17   :  { %p239_p10 = pnand %p237_p9, %p234_p8 }
  0x19   :  { %242 = shalt.err (!%p239_p10)
}
  0x1a   :  { %s243_s8 = scalar_lea.vmem %s333_s15, 128  ;;  %p248_p12 = scmp.lt.s32.totalorder %s333_s15, %s333_s15 }
  0x1b   :  { %p244_p11 = scmp.ne.s32.totalorder %s333_s15, %s243_s8  ;;  %p249_p13 = scmp.lt.s32.totalorder %s243_s8, %s243_s8 }
  0x1d   :  { %p250_p0 = por %p249_p13, %p248_p12 }
  0x1f   :  { %p251_p1 = pnand %p250_p0, %p244_p11 }
  0x21   :  { %254 = shalt.err (!%p251_p1)
}
  0x22   :  { %22 = dma.hbm_to_vmem [thread:$0]  %s401_s0, 128, %s333_s15, [#allocation4], %s307_s24, %s307_s24, %s308_s25  }
  0x23   :  { %s309_s10 = smov [#allocation8]   ;;  %s255_s14 = scalar_lea.hbm %s403_s2, 16 }
  0x24   :  { %s41_s11 = sshll.u32 %s309_s10, 4  ;;  %p256_p2 = scmp.ne.s32.totalorder %s403_s2, %s255_s14  ;;  %s42_s11 = int_to_ptr.vmem [resolvable:$true] %s41_s11 }
  0x25   :  { %p259_p3 = scmp.lt.u32.totalorder %s255_s14, %s403_s2 }
  0x27   :  { %p261_p4 = pnand %p259_p3, %p256_p2 }
  0x29   :  { %264 = shalt.err (!%p261_p4)
}
  0x2a   :  { %s265_s20 = scalar_lea.vmem %s42_s11, 16  ;;  %s269_s0 = scalar_lea.vmem %s42_s11, 32 }
  0x2b   :  { %p266_p5 = scmp.ne.s32.totalorder %s42_s11, %s265_s20  ;;  %p270_p6 = scmp.lt.s32.totalorder %s42_s11, %s42_s11 }
  0x2c   :  { %p271_p7 = scmp.lt.s32.totalorder %s269_s0, %s265_s20 }
  0x2e   :  { %p272_p8 = por %p271_p7, %p270_p6 }
  0x30   :  { %p273_p9 = pnand %p272_p8, %p266_p5 }
  0x32   :  { %276 = shalt.err (!%p273_p9)
}
  0x33   :  { %44 = dma.hbm_to_vmem [thread:$0]  %s403_s2, 16, %s42_s11, [#allocation7]  }
  0x34   :  { %299 = dma.done.wait [#allocation4], 128  }
  0x35   :  { %300 = vsyncadd [#allocation4], 4294967168 }
  0x36   :  { %301 = dma.done.wait [#allocation7], 272  }
  0x37   :  { %302 = vsyncadd [#allocation7], 4294967024  ;;  %vm59_vm0 = vcmask 785408   ;;  %v310_v0 = vmov 0.0   ;;  %vm311_vm1 = vmmov 0   ;;  %v208_v1 = vld [vmem:[#allocation6] sm:$0xff]  }
  0x38   :  { %60 = vst.msk [vmem:[#allocation2] sm:$0xff] %vm59_vm0, %v310_v0  ;;  %61 = vst.msk [vmem:[#allocation2 + $0x8] sm:$0xff] %vm59_vm0, %v310_v0  ;;  %192 = vmatprep.subr.bf16.mxu0 %v310_v0  ;;  %196 = vmatprep.mubr.msk.bf16.mxu0 %vm311_vm1, %v310_v0  ;;  %v209_v2 = vld [vmem:[#allocation6 + $0x8] sm:$0xff]   ;;  %v210_v3 = vld [vmem:[#allocation3] sm:$0xff]   ;;  %vm87_vm2 = vcmask 261120   ;;  %vm159_vm3 = vcmask 781312  }
  0x39   :  { %193 = vmatpush3.bf16.msra.mxu0 %v208_v1  ;;  %v184_v12 = vld [vmem:[#allocation8] ss:$0 sm:$0xff]  ;;  %s312_s2 = smov [#allocation9]  }
  0x3a   :  { %194 = vmatprep.subr.bf16.mxu0 %v310_v0  ;;  %s167_s22 = sshll.u32 %s312_s2, 4  ;;  %s168_s22 = int_to_ptr.vmem [resolvable:$true] %s167_s22 }
  0x3b   :  { %s277_s23 = scalar_lea.vmem %s168_s22, 128  ;;  %p282_p11 = scmp.lt.s32.totalorder %s168_s22, %s168_s22 }
  0x3c   :  { %p278_p10 = scmp.ne.s32.totalorder %s168_s22, %s277_s23  ;;  %p283_p12 = scmp.lt.s32.totalorder %s277_s23, %s277_s23 }
  0x3d   :  { %195 = vmatpush3.bf16.msra.mxu0 %v209_v2 }
  0x3e   :  { %p284_p13 = por %p283_p12, %p282_p11 }
  0x3f   :  { %v62_v4 = vld [vmem:[#allocation2] sm:$0xff]  ;;  %v63_v6 = vld [vmem:[#allocation2 + $0x8] sm:$0xff] }
  0x40   :  { %197 = vmatmul.mubr.msk.bf16.vlgmr.msra.gmra.mrb[0].mxu0 %vm87_vm2, %v210_v3  ;;  %p285_p0 = pnand %p284_p13, %p278_p10 }
 0x113   :  { %v125_v5 = vpop.f32.mrb[0].mxu0 }
 0x114   :  { %v132_v7 = vadd.f32 %v125_v5, %v62_v4  ;;  %v198_v8 = vpop.f32.mrb[1].mxu0 }
 0x115   :  { %v128_v9 = vpop.f32.mrb[2].mxu0 }
 0x116   :  { %135 = vst.msk [vmem:[#allocation2] sm:$0xff] %vm59_vm0, %v132_v7  ;;  %v133_v10 = vadd.f32 %v128_v9, %v63_v6  ;;  %v199_v11 = vpop.f32.mrb[3].mxu0 }
 0x118   :  { %136 = vst.msk [vmem:[#allocation2 + $0x8] sm:$0xff] %vm59_vm0, %v133_v10 }
 0x11d   :  { %v140_v13 = vld [vmem:[#allocation2] sm:$0xff] }
 0x11e   :  { %v149_v14 = vadd.f32 %v184_v12, %v140_v13 }
 0x11f   :  { %v141_v15 = vld [vmem:[#allocation2 + $0x8] sm:$0xff] }
 0x120   :  { %v150_v16 = vadd.f32 %v184_v12, %v141_v15  ;;  %v187_v17 = vpack.c.bf16 %v149_v14, %v149_v14 }
 0x122   :  { %v188_v18 = vpack.c.bf16 %v150_v16, %v150_v16  ;;  %160 = vst.msk [vmem:[#allocation9] sm:$0xf] %vm159_vm3, %v187_v17 }
 0x124   :  { %161 = vst.msk [vmem:[#allocation9 + $0x4] sm:$0xf] %vm159_vm3, %v188_v18 }
 0x125   :  { %288 = shalt.err (!%p285_p0)
}
 0x126   :  { %s289_s28 = scalar_lea.hbm %s404_s3, 128 }
 0x127   :  { %p290_p1 = scmp.ne.s32.totalorder %s404_s3, %s289_s28  ;;  %p293_p2 = scmp.lt.u32.totalorder %s289_s28, %s404_s3 }
 0x129   :  { %p295_p3 = pnand %p293_p2, %p290_p1 }
 0x12b   :  { %298 = shalt.err (!%p295_p3)
}
 0x12c   :  { %173 = dma.vmem_to_hbm [thread:$0]  %s168_s22, 128, %s404_s3, [#allocation5], %s307_s24, %s307_s24, %s308_s25  }
 0x12d   :  { %303 = dma.done.wait [#allocation5], 128  }
 0x12e   :  { %304 = vsyncadd [#allocation5], 4294967168 }
 0x12f   :  { %177 = vsyncpa [#allocation4], 1 }
 0x130   :  { %178 = vsyncpa [#allocation7], 1 }
 0x131   :  { %179 = vsyncpa [#allocation5], 1 }

</bundles_post_ra>
